<compile_context>
chip_gen: v5e
topology: v5e:2x2
jax: 0.10.0
libtpu: 0.0.40
codegen_flags: <defaults>
</compile_context>

<pallas_src>
import jax
import jax.numpy as jnp
from jax import lax
from jax.experimental import pallas as pl
from jax.experimental.pallas import tpu as pltpu

L1_WEIGHT = 1.0
PERCEPTUAL_WEIGHT = 0.1

_LANES = 128


def _chip_config():
    """Per-generation tiling knobs (trace-time host query; conservative default)."""
    kind = ""
    try:
        kind = jax.devices()[0].device_kind.lower()
    except Exception:
        pass
    if "v7" in kind or "7x" in kind:
        # 2 TC/chip, 64 MiB VMEM/TC, ~3.2 TB/s HBM: big tiles + 2-way core split.
        return {"n_tc": 2, "block_bytes": 6 << 20,
                "vmem_budget": 44 << 20, "vmem_limit": 56 << 20}
    if "v6" in kind:
        # 1 TC/chip, 128 MiB VMEM, ~1.4 TB/s HBM: medium tiles, no core split.
        return {"n_tc": 1, "block_bytes": 4 << 20,
                "vmem_budget": 56 << 20, "vmem_limit": 64 << 20}
    # v5e / unknown: conservative (matches the previously validated config).
    return {"n_tc": 1, "block_bytes": 2 << 20,
            "vmem_budget": 24 << 20, "vmem_limit": 32 << 20}


def _layout_plan(n):
    """Pick (cols, needs_pad) giving a lane-dense (>=128-wide) 2D slab layout."""
    if n % _LANES == 0:
        return _LANES, False
    # Search divisors of n that are >= 128; prefer best lane utilization, then
    # more rows (smaller cols) so the row-tiler has something to stream over.
    divisors = set()
    i = 1
    while i * i <= n:
        if n % i == 0:
            divisors.add(i)
            divisors.add(n // i)
        i += 1
    cands = [d for d in divisors if d >= _LANES]
    if cands:
        def score(d):
            lane_util = d / (_LANES * ((d + _LANES - 1) // _LANES))
            return (lane_util, -d)
        cols = max(cands, key=score)
        rows = n // cols
        # Accept if streamable (>=8 rows) or the whole array is tiny anyway;
        # otherwise a row-starved factorization would force a huge VMEM block.
        if rows >= 8 or n * 4 <= (1 << 20):
            return cols, False
    # No usable factor (tiny / prime-ish n): one-time flat zero pad to 128.
    return _LANES, True


def _as_lane_dense_2d(pred, target):
    """Copy-free reshape to a lane-dense 2D slab (zero pad only as a last resort)."""
    n = pred.size
    cols, needs_pad = _layout_plan(n)
    if needs_pad:
        pad = (-n) % cols
        # Zero pad on BOTH inputs -> diff == 0 -> contributes 0 to both sums.
        pred = jnp.pad(pred.reshape(-1), (0, pad))
        target = jnp.pad(target.reshape(-1), (0, pad))
    return pred.reshape(-1, cols), target.reshape(-1, cols)


def _make_kernel(rows, cols, tile_r, tiles_per_core, mask_from):
    grouped = (tile_r % 8 == 0)

    def accumulate(out_ref, ad, sq):
        if grouped:
            # Elementwise (VPU-only) accumulation into the resident (8, cols)
            # output slabs; no per-step cross-lane reduce.
            out_ref[0, 0, :, :] += jnp.sum(ad.reshape(tile_r // 8, 8, cols), axis=0)
            out_ref[0, 1, :, :] += jnp.sum(sq.reshape(tile_r // 8, 8, cols), axis=0)
        else:
            # Tiny-input fallback (rows < 8): accumulate into sublane row 0.
            out_ref[0, 0, 0:1, :] += jnp.sum(ad, axis=0, keepdims=True)
            out_ref[0, 1, 0:1, :] += jnp.sum(sq, axis=0, keepdims=True)

    def kernel(pred_ref, targ_ref, out_ref):
        c = pl.program_id(0)   # core / row-range index
        i = pl.program_id(1)   # reduction step within this core's row range

        @pl.when(i == 0)
        def _():
            out_ref[...] = jnp.zeros_like(out_ref)

        d = pred_ref[...].astype(jnp.float32) - targ_ref[...].astype(jnp.float32)

        if mask_from is None:
            accumulate(out_ref, jnp.abs(d), d * d)
        else:
            idx = c * tiles_per_core + i

            # Maskless fast path for every full tile.
            @pl.when(idx < mask_from)
            def _():
                accumulate(out_ref, jnp.abs(d), d * d)

            # Only the final partial tile / duplicated clamped tile pays for the
            # mask.  Keep the *select* form: the rows past the logical end of the
            # array are uninitialized VMEM and may hold NaN/Inf, which a
            # multiply-style mask would propagate.
            @pl.when(idx >= mask_from)
            def _():
                start = idx * tile_r
                row_ids = lax.broadcasted_iota(jnp.int32, (tile_r, 1), 0)
                dm = jnp.where(row_ids < (rows - start), d, 0.0)
                accumulate(out_ref, jnp.abs(dm), dm * dm)

    return kernel


def colorization_loss(pred, target, l1_weight=L1_WEIGHT,
                      perceptual_weight=PERCEPTUAL_WEIGHT):
    """Matches ColorizationLoss.forward: returns (total_loss, {'l1':.., 'mse':..})."""
    assert pred.shape == target.shape, "pred/target shape mismatch"
    n = pred.size
    pred2d, targ2d = _as_lane_dense_2d(pred, target)
    rows, cols = pred2d.shape

    cfg = _chip_config()
    itemsize = max(jnp.dtype(pred.dtype).itemsize, jnp.dtype(target.dtype).itemsize)

    # Row tile: chip-sized blocks measured in *actual* input bytes, additionally
    # capped by a VMEM budget that accounts for double-buffered inputs plus ~4
    # f32-sized elementwise temporaries inside the kernel.
    per_row_hot = cols * (4 * itemsize + 4 * 4)
    tile_r = min(cfg["block_bytes"] // (cols * itemsize),
                 max(8, cfg["vmem_budget"] // per_row_hot))
    tile_r = max(8, tile_r)
    tile_r = (tile_r // 8) * 8
    if rows >= 8:
        tile_r = min(tile_r, (rows // 8) * 8)
    else:
        tile_r = rows  # full-dim block (always legal); kernel uses fallback path

    total_tiles = pl.cdiv(rows, tile_r)
    # 2-way TensorCore split only where it exists (v7x); on 1-TC chips it was
    # pure overhead (extra grid step, duplicated masked tile, accumulator re-init).
    n_cores = 2 if (cfg["n_tc"] == 2 and total_tiles >= 2) else 1
    tiles_per_core = pl.cdiv(total_tiles, n_cores)
    clamp_idx = (n_cores * tiles_per_core != total_tiles)
    partial_last = (rows % tile_r != 0)
    if partial_last:
        mask_from = total_tiles - 1          # last real tile is partial
    elif clamp_idx:
        mask_from = total_tiles              # only the duplicated tile is masked
    else:
        mask_from = None                     # fully maskless kernel

    last_block = total_tiles - 1

    def in_map(c, i):
        idx = c * tiles_per_core + i
        if clamp_idx:
            # Duplicated trailing tile re-reads the last valid block; its
            # contribution is zeroed by the in-kernel mask.
            idx = jnp.minimum(idx, last_block)
        return (idx, 0)

    kernel = _make_kernel(rows, cols, tile_r, tiles_per_core, mask_from)

    in_bytes = n * (jnp.dtype(pred.dtype).itemsize + jnp.dtype(target.dtype).itemsize)
    out_bytes = n_cores * 2 * 8 * cols * 4
    cost = pl.CostEstimate(flops=5 * n, transcendentals=0,
                           bytes_accessed=in_bytes + out_bytes)

    partials = pl.pallas_call(
        kernel,
        out_shape=jax.ShapeDtypeStruct((n_cores, 2, 8, cols), jnp.float32),
        grid_spec=pltpu.PrefetchScalarGridSpec(
            num_scalar_prefetch=0,
            grid=(n_cores, tiles_per_core),
            in_specs=[
                pl.BlockSpec((tile_r, cols), in_map),
                pl.BlockSpec((tile_r, cols), in_map),
            ],
            out_specs=pl.BlockSpec((1, 2, 8, cols), lambda c, i: (c, 0, 0, 0)),
        ),
        # TODO(synk): verify on v7x (via xprof/bundle dump) that the leading
        # "parallel" axis actually shards one row-range per TensorCore; if it
        # runs serially, switch that axis to pltpu.CORE_PARALLEL.
        compiler_params=pltpu.CompilerParams(
            dimension_semantics=("parallel", "arbitrary"),
            vmem_limit_bytes=cfg["vmem_limit"],
        ),
        cost_estimate=cost,
    )(pred2d, targ2d)

    # Tiny epilogue: cross-core + cross-lane reduce of the (n_cores, 2, 8, cols)
    # partial-sum slabs, then the weighted combination.
    sums = jnp.sum(partials, axis=(0, 2, 3))  # [sum |d|, sum d^2]
    inv_n = 1.0 / float(n)
    l1 = sums[0] * inv_n        # nn.L1Loss(reduction='mean')
    mse = sums[1] * inv_n       # nn.MSELoss(reduction='mean')
    total = l1_weight * l1 + perceptual_weight * mse
    # TODO(synk): PyTorch returns .item() Python floats in the dict; we return
    # JAX scalars to avoid a device->host sync and keep the loss jittable.
    return total, {"l1": l1, "mse": mse}


def _ref_loss(pred, target):
    l1 = jnp.mean(jnp.abs(pred - target))
    mse = jnp.mean((pred - target) ** 2)
    return L1_WEIGHT * l1 + PERCEPTUAL_WEIGHT * mse, l1, mse


if __name__ == "__main__":
    key = jax.random.PRNGKey(0)
    k1, k2, k3, k4, k5, k6 = jax.random.split(key, 6)

    # 1) NCHW colorization-head output: batch=2, channels=4, 16x16.
    pred = jax.random.normal(k1, (2, 4, 16, 16), dtype=jnp.float32)
    target = jax.random.normal(k2, (2, 4, 16, 16), dtype=jnp.float32)

    loss_fn = jax.jit(colorization_loss)
    total, parts = loss_fn(pred, target)
    total = jax.block_until_ready(total)

    ref_total, ref_l1, ref_mse = _ref_loss(pred, target)
    assert jnp.allclose(total, ref_total, rtol=1e-5, atol=1e-6), (total, ref_total)
    assert jnp.allclose(parts["l1"], ref_l1, rtol=1e-5, atol=1e-6)
    assert jnp.allclose(parts["mse"], ref_mse, rtol=1e-5, atol=1e-6)

    # 2) Ragged shape (n % 128 != 0): exercises the lane-dense divisor layout and
    #    the tiny-row fallback accumulation path.
    pred2 = jax.random.normal(k3, (2, 3, 5, 16), dtype=jnp.float32)
    target2 = jax.random.normal(k4, (2, 3, 5, 16), dtype=jnp.float32)
    total2, _ = jax.jit(colorization_loss)(pred2, target2)
    total2 = jax.block_until_ready(total2)
    ref_total2, _, _ = _ref_loss(pred2, target2)
    assert jnp.allclose(total2, ref_total2, rtol=1e-5, atol=1e-6), (total2, ref_total2)

    # 3) Multi-tile shape: exercises the streaming accumulator and the pl.when-
    #    gated tail mask on the final partial tile (and the core split on v7x).
    pred3 = jax.random.normal(k5, (2, 4, 360, 360), dtype=jnp.float32)
    target3 = jax.random.normal(k6, (2, 4, 360, 360), dtype=jnp.float32)
    total3, parts3 = jax.jit(colorization_loss)(pred3, target3)
    total3 = jax.block_until_ready(total3)
    ref_total3, ref_l13, ref_mse3 = _ref_loss(pred3, target3)
    assert jnp.allclose(total3, ref_total3, rtol=1e-4, atol=1e-6), (total3, ref_total3)
    assert jnp.allclose(parts3["l1"], ref_l13, rtol=1e-4, atol=1e-6)
    assert jnp.allclose(parts3["mse"], ref_mse3, rtol=1e-4, atol=1e-6)

    print("KERNEL_OK")
</pallas_src>

<mosaic_0001>
module attributes {stable_mosaic.version = 11 : i64} {
  func.func @kernel(%arg0: i32, %arg1: i32, %arg2: memref<16x128xf32, #tpu.memory_space<vmem>>, %arg3: memref<16x128xf32, #tpu.memory_space<vmem>>, %arg4: memref<1x2x8x128xf32, #tpu.memory_space<vmem>>) attributes {dimension_semantics = [#tpu.dimension_semantics<parallel>, #tpu.dimension_semantics<arbitrary>], iteration_bounds = array<i64: 1, 1>, scalar_prefetch = 0 : i64, scratch_operands = 0 : i64, tpu.core_type = #tpu.core_type<tc>, window_params = [{transform_indices = @transform_0, window_bounds = array<i64: 16, 128>}, {transform_indices = @transform_1, window_bounds = array<i64: 16, 128>}, {transform_indices = @transform_2, window_bounds = array<i64: 1, 2, 8, 128>}]} {
    %c0_i32 = arith.constant 0 : i32
    %0 = arith.cmpi eq, %arg1, %c0_i32 : i32
    %1 = arith.extui %0 : i1 to i32
    %c0_i32_0 = arith.constant 0 : i32
    %2 = arith.cmpi ne, %1, %c0_i32_0 : i32
    scf.if %2 {
      %cst_20 = arith.constant 0.000000e+00 : f32
      %24 = vector.broadcast %cst_20 : f32 to vector<1x2x8x128xf32>
      %c0_21 = arith.constant 0 : index
      %c0_22 = arith.constant 0 : index
      %c0_23 = arith.constant 0 : index
      %c0_24 = arith.constant 0 : index
      %25 = vector.load %arg4[%c0_21, %c0_22, %c0_23, %c0_24] : memref<1x2x8x128xf32, #tpu.memory_space<vmem>>, vector<1x2x8x128xf32>
      tpu.vector_store %arg4[%c0_21, %c0_22, %c0_23, %c0_24], %24 {strides = array<i32>} : memref<1x2x8x128xf32, #tpu.memory_space<vmem>>, vector<1x2x8x128xf32>,
    } else {
    }
    %c0 = arith.constant 0 : index
    %c0_1 = arith.constant 0 : index
    %3 = vector.load %arg2[%c0, %c0_1] : memref<16x128xf32, #tpu.memory_space<vmem>>, vector<16x128xf32>
    %c0_2 = arith.constant 0 : index
    %c0_3 = arith.constant 0 : index
    %4 = vector.load %arg3[%c0_2, %c0_3] : memref<16x128xf32, #tpu.memory_space<vmem>>, vector<16x128xf32>
    %5 = arith.subf %3, %4 : vector<16x128xf32>
    %6 = math.absf %5 : vector<16x128xf32>
    %7 = arith.mulf %5, %5 : vector<16x128xf32>
    %c0_4 = arith.constant 0 : index
    %c0_5 = arith.constant 0 : index
    %c0_6 = arith.constant 0 : index
    %c0_7 = arith.constant 0 : index
    %8 = vector.load %arg4[%c0_4, %c0_5, %c0_6, %c0_7] : memref<1x2x8x128xf32, #tpu.memory_space<vmem>>, vector<1x1x8x128xf32>
    %9 = vector.shape_cast %8 : vector<1x1x8x128xf32> to vector<8x128xf32>
    %10 = vector.shape_cast %6 : vector<16x128xf32> to vector<2x8x128xf32>
    %cst = arith.constant dense<0.000000e+00> : vector<8x128xf32>
    %11 = vector.multi_reduction <add>, %10, %cst [0] : vector<2x8x128xf32> to vector<8x128xf32>
    %12 = arith.addf %9, %11 : vector<8x128xf32>
    %c0_8 = arith.constant 0 : index
    %c0_9 = arith.constant 0 : index
    %c0_10 = arith.constant 0 : index
    %c0_11 = arith.constant 0 : index
    %13 = vector.load %arg4[%c0_8, %c0_9, %c0_10, %c0_11] : memref<1x2x8x128xf32, #tpu.memory_space<vmem>>, vector<1x1x8x128xf32>
    %14 = vector.shape_cast %13 : vector<1x1x8x128xf32> to vector<8x128xf32>
    %15 = vector.shape_cast %12 : vector<8x128xf32> to vector<1x1x8x128xf32>
    tpu.vector_store %arg4[%c0_8, %c0_9, %c0_10, %c0_11], %15 {strides = array<i32>} : memref<1x2x8x128xf32, #tpu.memory_space<vmem>>, vector<1x1x8x128xf32>,
    %c0_12 = arith.constant 0 : index
    %c1 = arith.constant 1 : index
    %c0_13 = arith.constant 0 : index
    %c0_14 = arith.constant 0 : index
    %16 = vector.load %arg4[%c0_12, %c1, %c0_13, %c0_14] : memref<1x2x8x128xf32, #tpu.memory_space<vmem>>, vector<1x1x8x128xf32>
    %17 = vector.shape_cast %16 : vector<1x1x8x128xf32> to vector<8x128xf32>
    %18 = vector.shape_cast %7 : vector<16x128xf32> to vector<2x8x128xf32>
    %cst_15 = arith.constant dense<0.000000e+00> : vector<8x128xf32>
    %19 = vector.multi_reduction <add>, %18, %cst_15 [0] : vector<2x8x128xf32> to vector<8x128xf32>
    %20 = arith.addf %17, %19 : vector<8x128xf32>
    %c0_16 = arith.constant 0 : index
    %c1_17 = arith.constant 1 : index
    %c0_18 = arith.constant 0 : index
    %c0_19 = arith.constant 0 : index
    %21 = vector.load %arg4[%c0_16, %c1_17, %c0_18, %c0_19] : memref<1x2x8x128xf32, #tpu.memory_space<vmem>>, vector<1x1x8x128xf32>
    %22 = vector.shape_cast %21 : vector<1x1x8x128xf32> to vector<8x128xf32>
    %23 = vector.shape_cast %20 : vector<8x128xf32> to vector<1x1x8x128xf32>
    tpu.vector_store %arg4[%c0_16, %c1_17, %c0_18, %c0_19], %23 {strides = array<i32>} : memref<1x2x8x128xf32, #tpu.memory_space<vmem>>, vector<1x1x8x128xf32>,
    return
  }
  func.func @transform_0(%arg0: i32, %arg1: i32) -> (i32, i32) {
    %c1_i32 = arith.constant 1 : i32
    %0 = arith.muli %arg0, %c1_i32 : i32
    %1 = arith.addi %0, %arg1 : i32
    %c0_i32 = arith.constant 0 : i32
    %c0_i32_0 = arith.constant 0 : i32
    return %1, %c0_i32 : i32, i32
  }
  func.func @transform_1(%arg0: i32, %arg1: i32) -> (i32, i32) {
    %c1_i32 = arith.constant 1 : i32
    %0 = arith.muli %arg0, %c1_i32 : i32
    %1 = arith.addi %0, %arg1 : i32
    %c0_i32 = arith.constant 0 : i32
    %c0_i32_0 = arith.constant 0 : i32
    return %1, %c0_i32 : i32, i32
  }
  func.func @transform_2(%arg0: i32, %arg1: i32) -> (i32, i32, i32, i32) {
    %c0_i32 = arith.constant 0 : i32
    %c0_i32_0 = arith.constant 0 : i32
    %c0_i32_1 = arith.constant 0 : i32
    %c0_i32_2 = arith.constant 0 : i32
    return %arg0, %c0_i32, %c0_i32_0, %c0_i32_1 : i32, i32, i32, i32
  }
}

</mosaic_0001>

<bundles_post_ra>
// kernel: colorization_loss.1
= control target key start
LH: loop header
LB: loop body
LE: loop exit
PB: predicated region body
PF: predicated region fallthrough
CT: control target
= control target key end

     0   :  { %s132_s0 = inlined_call_operand.vmem [shape: f32[16,128], index: 0, kind: input, shape index: {}]   ;;  %s133_s1 = inlined_call_operand.vmem [shape: f32[16,128], index: 1, kind: input, shape index: {}]   ;;  %s134_s2 = inlined_call_operand.vmem [shape: f32[1,2,8,128], index: 2, kind: output, shape index: {}]  }
   0x1   :  { %v61_v0 = vld [vmem:[%s132_s0] sm:$0xff]  ;;  %v62_v1 = vld [vmem:[%s132_s0 + $0x8] sm:$0xff] }
   0x2   :  { %v63_v2 = vld [vmem:[%s133_s1] sm:$0xff]  ;;  %v64_v3 = vld [vmem:[%s133_s1 + $0x8] sm:$0xff] }
   0x3   :  { %v65_v4 = vsub.f32 %v61_v0, %v63_v2  ;;  %v66_v5 = vsub.f32 %v62_v1, %v64_v3 }
   0x5   :  { %v67_v6 = vand.u32 2147483647, %v65_v4  ;;  %v69_v7 = vmul.f32 %v65_v4, %v65_v4  ;;  %v68_v8 = vand.u32 2147483647, %v66_v5  ;;  %v70_v9 = vmul.f32 %v66_v5, %v66_v5 }
   0x7   :  { %v72_v10 = vadd.f32 %v68_v8, %v67_v6  ;;  %v77_v11 = vadd.f32 %v70_v9, %v69_v7 }
   0x9   :  { %74 = vst [vmem:[%s134_s2] sm:$0xff] %v72_v10 }
   0xa   :  { %97 = vst [vmem:[%s134_s2 + $0x8] sm:$0xff] %v77_v11 }

</bundles_post_ra>
